<compile_context>
chip_gen: v5e
topology: v5e:2x2
jax: 0.10.0
libtpu: 0.0.40
codegen_flags: <defaults>
</compile_context>

<pallas_src>
import functools

import jax
import jax.numpy as jnp
from jax.experimental import pallas as pl

N_EMBED = 30      # n_embed from the reference script
BLOCK_SIZE = 256  # max context in the reference (we only need T <= 256)
EPS = 1e-5        # nn.LayerNorm default eps
LANE = 128        # TPU lane width


def _round_up(n, m):
    return ((n + m - 1) // m) * m


def _layernorm_padded(x, g, b, c_real):
    # x has exact zeros in the padded lanes, so lane-sums equal sums over the real
    # channels; divide by the real channel count and use E[x^2] - mu^2 so padded lanes
    # never contribute.  g/b are zero in padded lanes -> output padded lanes stay zero.
    inv_c = 1.0 / c_real
    mu = jnp.sum(x, axis=-1, keepdims=True) * inv_c
    ss = jnp.sum(x * x, axis=-1, keepdims=True) * inv_c
    var = ss - mu * mu
    return (x - mu) * jax.lax.rsqrt(var + EPS) * g + b


def block_kernel(x_ref, amask_ref, hmask_ref, g1_ref, b1_ref, wqkv_ref, wp_ref,
                 bp_ref, g2_ref, b2_ref, w1_ref, bf1_ref, w2_ref, bf2_ref,
                 out_ref, *, num_heads, c_real):
    """Whole block, batch collapsed into rows: x_ref is (M = B*T, 128)."""
    x = x_ref[...]                                             # (M, 128), padded lanes zero

    # ---------------- self-attention branch: x + sa(ln1(x)) ----------------
    xn = _layernorm_padded(x, g1_ref[...], b1_ref[...], c_real)

    # Fused QKV projection; scale C**0.5 already folded into the Q columns.
    qkv = jnp.dot(xn, wqkv_ref[...], preferred_element_type=jnp.float32)  # (M, 3*128)
    q_all = qkv[:, 0 * LANE:1 * LANE]   # heads packed: head h at lanes [h*hs, (h+1)*hs)
    k_all = qkv[:, 1 * LANE:2 * LANE]
    v_all = qkv[:, 2 * LANE:3 * LANE]

    allowed = amask_ref[...] != 0.0     # (M, M) same-batch AND causal; diagonal allowed
    hmask = hmask_ref[...]              # (num_heads, 128) per-head lane masks

    o_packed = jnp.zeros_like(q_all)    # head outputs packed into one 128-lane block
    for h in range(num_heads):
        hm = hmask[h:h + 1, :]                                  # (1, 128)
        qh = q_all * hm                                         # isolate head h lanes
        # q_h @ k_h^T: contraction over lanes; zeros in qh kill other heads' lanes.
        s = jax.lax.dot_general(qh, k_all, (((1,), (1,)), ((), ())),
                                preferred_element_type=jnp.float32)       # (M, M)
        s = jnp.where(allowed, s, -jnp.inf)
        m = jnp.max(s, axis=-1, keepdims=True)                  # finite: diag unmasked
        p = jnp.exp(s - m)
        p = p / jnp.sum(p, axis=-1, keepdims=True)              # exact f32 softmax
        # p @ v_all then keep only head h's lanes of the result.
        o_packed = o_packed + jnp.dot(p, v_all,
                                      preferred_element_type=jnp.float32) * hm

    sa = jnp.dot(o_packed, wp_ref[...],
                 preferred_element_type=jnp.float32) + bp_ref[...]
    x1 = x + sa

    # ---------------- feed-forward branch: x1 + ffw(ln2(x1)) ---------------
    xn2 = _layernorm_padded(x1, g2_ref[...], b2_ref[...], c_real)
    h1 = jnp.maximum(
        jnp.dot(xn2, w1_ref[...], preferred_element_type=jnp.float32) + bf1_ref[...],
        0.0)
    ff = jnp.dot(h1, w2_ref[...], preferred_element_type=jnp.float32) + bf2_ref[...]

    out_ref[...] = x1 + ff


# ------------------------ one-time weight padding / packing ------------------------

def _pad2(a, r, c):
    return jnp.zeros((r, c), jnp.float32).at[:a.shape[0], :a.shape[1]].set(
        a.astype(jnp.float32))


def pack_params(params, num_heads):
    """Pad & pack weights once (lane-dense, heads packed, scale folded into wq)."""
    C = params["wk"].shape[0]
    hs = params["wk"].shape[1] // num_heads
    hdim = num_heads * hs
    f = params["w1"].shape[1]
    f_pad = _round_up(f, LANE)
    assert C <= LANE and hdim <= LANE and f <= f_pad

    scale = jnp.float32(C) ** 0.5            # reference multiplies scores by C**0.5

    # Fused QKV weight: columns [0:128]=Q (scaled), [128:256]=K, [256:384]=V.
    wqkv = jnp.concatenate(
        [_pad2(params["wq"] * scale, LANE, LANE),
         _pad2(params["wk"], LANE, LANE),
         _pad2(params["wv"], LANE, LANE)], axis=1)

    # Per-head lane masks for the packed 128-lane head block.
    lane = jnp.arange(LANE)
    hmask = jnp.stack(
        [((lane >= h * hs) & (lane < (h + 1) * hs)).astype(jnp.float32)
         for h in range(num_heads)], axis=0)                    # (num_heads, 128)

    return {
        "g1": _pad2(params["g1"], 1, LANE),
        "b1": _pad2(params["b1"], 1, LANE),
        "g2": _pad2(params["g2"], 1, LANE),
        "b2": _pad2(params["b2"], 1, LANE),
        "wqkv": wqkv,
        "wp": _pad2(params["wp"], LANE, LANE),   # row h*hs..(h+1)*hs matches packed lanes
        "bp": _pad2(params["bp"], 1, LANE),
        "w1": _pad2(params["w1"], LANE, f_pad),
        "bf1": _pad2(params["bf1"], 1, f_pad),
        "w2": _pad2(params["w2"], f_pad, LANE),
        "bf2": _pad2(params["bf2"], 1, LANE),
        "hmask": hmask,
    }


# ------------------------------ jitted per-call wrapper ------------------------------

@functools.partial(jax.jit, static_argnames=("num_heads",))
def block_forward(x, packed, num_heads):
    B, T, C = x.shape
    M = B * T

    # Collapse batch into rows, zero-pad channels to 128 lanes.
    xp = jnp.zeros((M, LANE), jnp.float32).at[:, :C].set(
        x.reshape(M, C).astype(jnp.float32))

    # Block-causal mask over the collapsed rows (same batch AND causal).
    # Pure function of static shapes -> constant-folded at compile time.
    r = jnp.arange(M)
    same_batch = (r[:, None] // T) == (r[None, :] // T)
    causal = (r[:, None] % T) >= (r[None, :] % T)
    amask = (same_batch & causal).astype(jnp.float32)           # (M, M)

    kernel = functools.partial(block_kernel, num_heads=num_heads, c_real=float(C))

    # Single invocation, no grid: every operand is a whole-array VMEM block
    # (total footprint ~0.5 MiB, far below VMEM on v5e/v6e/v7x).
    out = pl.pallas_call(
        kernel,
        out_shape=jax.ShapeDtypeStruct((M, LANE), jnp.float32),
    )(xp, amask, packed["hmask"], packed["g1"], packed["b1"], packed["wqkv"],
      packed["wp"], packed["bp"], packed["g2"], packed["b2"],
      packed["w1"], packed["bf1"], packed["w2"], packed["bf2"])

    return out.reshape(B, T, LANE)[:, :, :C]


# ----------------------------- plain-JAX reference -----------------------------

def reference_forward(x, p, num_heads):
    """Plain-JAX reference mirroring the PyTorch module (eval mode), unpadded."""
    def ln(v, g, b):
        mu = v.mean(-1, keepdims=True)
        var = ((v - mu) ** 2).mean(-1, keepdims=True)
        return (v - mu) / jnp.sqrt(var + EPS) * g + b

    B, T, C = x.shape
    hs = p["wk"].shape[1] // num_heads
    xn = ln(x, p["g1"][0], p["b1"][0])
    k = xn @ p["wk"]
    q = xn @ p["wq"]
    v = xn @ p["wv"]
    mask = jnp.tril(jnp.ones((T, T), dtype=bool))
    outs = []
    for h in range(num_heads):
        sl = slice(h * hs, (h + 1) * hs)
        s = q[..., sl] @ jnp.swapaxes(k[..., sl], -1, -2) * (C ** 0.5)
        s = jnp.where(mask, s, -jnp.inf)
        w = jax.nn.softmax(s, axis=-1)
        outs.append(w @ v[..., sl])
    sa = jnp.concatenate(outs, axis=-1) @ p["wp"] + p["bp"][0]
    x1 = x + sa
    xn2 = ln(x1, p["g2"][0], p["b2"][0])
    ff = jnp.maximum(xn2 @ p["w1"] + p["bf1"][0], 0.0) @ p["w2"] + p["bf2"][0]
    return x1 + ff


def init_params(key, n_embed, num_heads):
    # Block passes n_embed as the per-head size -> each head has head_size = n_embed.
    head_size = n_embed
    hdim = num_heads * head_size
    ks = jax.random.split(key, 10)
    scale = 0.05
    return {
        "g1": jnp.ones((1, n_embed), jnp.float32),
        "b1": jnp.zeros((1, n_embed), jnp.float32),
        "g2": jnp.ones((1, n_embed), jnp.float32),
        "b2": jnp.zeros((1, n_embed), jnp.float32),
        # attention linears (bias=False for k/q/v), stored as (in, out)
        "wk": scale * jax.random.normal(ks[0], (n_embed, hdim), jnp.float32),
        "wq": scale * jax.random.normal(ks[1], (n_embed, hdim), jnp.float32),
        "wv": scale * jax.random.normal(ks[2], (n_embed, hdim), jnp.float32),
        "wp": scale * jax.random.normal(ks[3], (hdim, n_embed), jnp.float32),
        "bp": scale * jax.random.normal(ks[4], (1, n_embed), jnp.float32),
        # feed-forward
        "w1": scale * jax.random.normal(ks[5], (n_embed, 4 * n_embed), jnp.float32),
        "bf1": scale * jax.random.normal(ks[6], (1, 4 * n_embed), jnp.float32),
        "w2": scale * jax.random.normal(ks[7], (4 * n_embed, n_embed), jnp.float32),
        "bf2": scale * jax.random.normal(ks[8], (1, n_embed), jnp.float32),
    }


if __name__ == "__main__":
    B, T = 2, 8            # T <= block_size (256)
    n_embed = N_EMBED      # 30
    n_head = 3

    key = jax.random.PRNGKey(0)
    kx, kp = jax.random.split(key)
    x = jax.random.normal(kx, (B, T, n_embed), jnp.float32)
    params = init_params(kp, n_embed, n_head)

    packed = pack_params(params, n_head)          # one-time weight padding/packing
    out = block_forward(x, packed, num_heads=n_head)
    out = jax.block_until_ready(out)

    ref = reference_forward(x, params, n_head)
    assert out.shape == (B, T, n_embed)
    # Full f32, exact softmax division -> only ordering/padding roundoff remains.
    assert jnp.allclose(out, ref, atol=1e-4, rtol=1e-4), "mismatch vs JAX reference"

    print("KERNEL_OK")
</pallas_src>

<mosaic_0001>
module attributes {stable_mosaic.version = 11 : i64} {
  func.func @block_kernel(%arg0: memref<16x128xf32, #tpu.memory_space<vmem>>, %arg1: memref<16x16xf32, #tpu.memory_space<vmem>>, %arg2: memref<3x128xf32, #tpu.memory_space<vmem>>, %arg3: memref<1x128xf32, #tpu.memory_space<vmem>>, %arg4: memref<1x128xf32, #tpu.memory_space<vmem>>, %arg5: memref<128x384xf32, #tpu.memory_space<vmem>>, %arg6: memref<128x128xf32, #tpu.memory_space<vmem>>, %arg7: memref<1x128xf32, #tpu.memory_space<vmem>>, %arg8: memref<1x128xf32, #tpu.memory_space<vmem>>, %arg9: memref<1x128xf32, #tpu.memory_space<vmem>>, %arg10: memref<128x128xf32, #tpu.memory_space<vmem>>, %arg11: memref<1x128xf32, #tpu.memory_space<vmem>>, %arg12: memref<128x128xf32, #tpu.memory_space<vmem>>, %arg13: memref<1x128xf32, #tpu.memory_space<vmem>>, %arg14: memref<16x128xf32, #tpu.memory_space<vmem>>) attributes {dimension_semantics = [], scalar_prefetch = 0 : i64, scratch_operands = 0 : i64, tpu.core_type = #tpu.core_type<tc>} {
    %c0 = arith.constant 0 : index
    %c0_0 = arith.constant 0 : index
    %0 = vector.load %arg0[%c0, %c0_0] : memref<16x128xf32, #tpu.memory_space<vmem>>, vector<16x128xf32>
    %c0_1 = arith.constant 0 : index
    %c0_2 = arith.constant 0 : index
    %1 = vector.load %arg3[%c0_1, %c0_2] : memref<1x128xf32, #tpu.memory_space<vmem>>, vector<1x128xf32>
    %c0_3 = arith.constant 0 : index
    %c0_4 = arith.constant 0 : index
    %2 = vector.load %arg4[%c0_3, %c0_4] : memref<1x128xf32, #tpu.memory_space<vmem>>, vector<1x128xf32>
    %cst = arith.constant dense<0.000000e+00> : vector<16xf32>
    %3 = vector.multi_reduction <add>, %0, %cst [1] : vector<16x128xf32> to vector<16xf32>
    %4 = vector.shape_cast %3 : vector<16xf32> to vector<16x1xf32>
    %cst_5 = arith.constant 0.0333333351 : f32
    %5 = vector.broadcast %cst_5 : f32 to vector<16x1xf32>
    %6 = arith.mulf %4, %5 : vector<16x1xf32>
    %7 = arith.mulf %0, %0 : vector<16x128xf32>
    %cst_6 = arith.constant dense<0.000000e+00> : vector<16xf32>
    %8 = vector.multi_reduction <add>, %7, %cst_6 [1] : vector<16x128xf32> to vector<16xf32>
    %9 = vector.shape_cast %8 : vector<16xf32> to vector<16x1xf32>
    %cst_7 = arith.constant 0.0333333351 : f32
    %10 = vector.broadcast %cst_7 : f32 to vector<16x1xf32>
    %11 = arith.mulf %9, %10 : vector<16x1xf32>
    %12 = arith.mulf %6, %6 : vector<16x1xf32>
    %13 = arith.subf %11, %12 : vector<16x1xf32>
    %14 = vector.broadcast %6 : vector<16x1xf32> to vector<16x128xf32>
    %15 = arith.subf %0, %14 : vector<16x128xf32>
    %cst_8 = arith.constant 9.99999974E-6 : f32
    %16 = vector.broadcast %cst_8 : f32 to vector<16x1xf32>
    %17 = arith.addf %13, %16 : vector<16x1xf32>
    %18 = math.rsqrt %17 : vector<16x1xf32>
    %19 = vector.broadcast %18 : vector<16x1xf32> to vector<16x128xf32>
    %20 = arith.mulf %15, %19 : vector<16x128xf32>
    %21 = vector.broadcast %1 : vector<1x128xf32> to vector<16x128xf32>
    %22 = arith.mulf %20, %21 : vector<16x128xf32>
    %23 = vector.broadcast %2 : vector<1x128xf32> to vector<16x128xf32>
    %24 = arith.addf %22, %23 : vector<16x128xf32>
    %c0_9 = arith.constant 0 : index
    %c0_10 = arith.constant 0 : index
    %25 = vector.load %arg5[%c0_9, %c0_10] : memref<128x384xf32, #tpu.memory_space<vmem>>, vector<128x384xf32>
    %cst_11 = arith.constant dense<0.000000e+00> : vector<16x384xf32>
    %26 = tpu.matmul %24, %25, %cst_11 {dimension_numbers = #tpu.dot_dimension_numbers<[1], [0], [0], [1], [0, 0, 1, 1], [], []>} : vector<16x128xf32>, vector<128x384xf32>, vector<16x384xf32> -> vector<16x384xf32>
    %27 = vector.extract_strided_slice %26 {offsets = [0, 0], sizes = [16, 128], strides = [1, 1]} : vector<16x384xf32> to vector<16x128xf32>
    %28 = vector.extract_strided_slice %26 {offsets = [0, 128], sizes = [16, 128], strides = [1, 1]} : vector<16x384xf32> to vector<16x128xf32>
    %29 = vector.extract_strided_slice %26 {offsets = [0, 256], sizes = [16, 128], strides = [1, 1]} : vector<16x384xf32> to vector<16x128xf32>
    %c0_12 = arith.constant 0 : index
    %c0_13 = arith.constant 0 : index
    %30 = vector.load %arg1[%c0_12, %c0_13] : memref<16x16xf32, #tpu.memory_space<vmem>>, vector<16x16xf32>
    %cst_14 = arith.constant 0.000000e+00 : f32
    %31 = vector.broadcast %cst_14 : f32 to vector<16x16xf32>
    %32 = arith.cmpf one, %30, %31 : vector<16x16xf32>
    %c0_15 = arith.constant 0 : index
    %c0_16 = arith.constant 0 : index
    %33 = vector.load %arg2[%c0_15, %c0_16] : memref<3x128xf32, #tpu.memory_space<vmem>>, vector<3x128xf32>
    %cst_17 = arith.constant 0.000000e+00 : f32
    %34 = vector.broadcast %cst_17 : f32 to vector<16x128xf32>
    %35 = vector.extract_strided_slice %33 {offsets = [0, 0], sizes = [1, 128], strides = [1, 1]} : vector<3x128xf32> to vector<1x128xf32>
    %36 = vector.broadcast %35 : vector<1x128xf32> to vector<16x128xf32>
    %37 = arith.mulf %27, %36 : vector<16x128xf32>
    %cst_18 = arith.constant dense<0.000000e+00> : vector<16x16xf32>
    %38 = tpu.matmul %37, %28, %cst_18 {dimension_numbers = #tpu.dot_dimension_numbers<[1], [1], [0], [0], [0, 0, 1, 0], [], []>} : vector<16x128xf32>, vector<16x128xf32>, vector<16x16xf32> -> vector<16x16xf32>
    %cst_19 = arith.constant 0xFF800000 : f32
    %39 = vector.broadcast %cst_19 : f32 to vector<16x16xf32>
    %40 = arith.select %32, %38, %39 : vector<16x16xi1>, vector<16x16xf32>
    %cst_20 = arith.constant dense<0xFF800000> : vector<16xf32>
    %41 = vector.multi_reduction <maximumf>, %40, %cst_20 [1] : vector<16x16xf32> to vector<16xf32>
    %42 = vector.shape_cast %41 : vector<16xf32> to vector<16x1xf32>
    %43 = vector.broadcast %42 : vector<16x1xf32> to vector<16x16xf32>
    %44 = arith.subf %40, %43 : vector<16x16xf32>
    %45 = math.exp %44 : vector<16x16xf32>
    %cst_21 = arith.constant dense<0.000000e+00> : vector<16xf32>
    %46 = vector.multi_reduction <add>, %45, %cst_21 [1] : vector<16x16xf32> to vector<16xf32>
    %47 = vector.shape_cast %46 : vector<16xf32> to vector<16x1xf32>
    %48 = vector.broadcast %47 : vector<16x1xf32> to vector<16x16xf32>
    %49 = arith.divf %45, %48 : vector<16x16xf32>
    %cst_22 = arith.constant dense<0.000000e+00> : vector<16x128xf32>
    %50 = tpu.matmul %49, %29, %cst_22 {dimension_numbers = #tpu.dot_dimension_numbers<[1], [0], [0], [1], [0, 0, 1, 1], [], []>} : vector<16x16xf32>, vector<16x128xf32>, vector<16x128xf32> -> vector<16x128xf32>
    %51 = vector.broadcast %35 : vector<1x128xf32> to vector<16x128xf32>
    %52 = arith.mulf %50, %51 : vector<16x128xf32>
    %53 = arith.addf %34, %52 : vector<16x128xf32>
    %54 = vector.extract_strided_slice %33 {offsets = [1, 0], sizes = [1, 128], strides = [1, 1]} : vector<3x128xf32> to vector<1x128xf32>
    %55 = vector.broadcast %54 : vector<1x128xf32> to vector<16x128xf32>
    %56 = arith.mulf %27, %55 : vector<16x128xf32>
    %cst_23 = arith.constant dense<0.000000e+00> : vector<16x16xf32>
    %57 = tpu.matmul %56, %28, %cst_23 {dimension_numbers = #tpu.dot_dimension_numbers<[1], [1], [0], [0], [0, 0, 1, 0], [], []>} : vector<16x128xf32>, vector<16x128xf32>, vector<16x16xf32> -> vector<16x16xf32>
    %cst_24 = arith.constant 0xFF800000 : f32
    %58 = vector.broadcast %cst_24 : f32 to vector<16x16xf32>
    %59 = arith.select %32, %57, %58 : vector<16x16xi1>, vector<16x16xf32>
    %cst_25 = arith.constant dense<0xFF800000> : vector<16xf32>
    %60 = vector.multi_reduction <maximumf>, %59, %cst_25 [1] : vector<16x16xf32> to vector<16xf32>
    %61 = vector.shape_cast %60 : vector<16xf32> to vector<16x1xf32>
    %62 = vector.broadcast %61 : vector<16x1xf32> to vector<16x16xf32>
    %63 = arith.subf %59, %62 : vector<16x16xf32>
    %64 = math.exp %63 : vector<16x16xf32>
    %cst_26 = arith.constant dense<0.000000e+00> : vector<16xf32>
    %65 = vector.multi_reduction <add>, %64, %cst_26 [1] : vector<16x16xf32> to vector<16xf32>
    %66 = vector.shape_cast %65 : vector<16xf32> to vector<16x1xf32>
    %67 = vector.broadcast %66 : vector<16x1xf32> to vector<16x16xf32>
    %68 = arith.divf %64, %67 : vector<16x16xf32>
    %cst_27 = arith.constant dense<0.000000e+00> : vector<16x128xf32>
    %69 = tpu.matmul %68, %29, %cst_27 {dimension_numbers = #tpu.dot_dimension_numbers<[1], [0], [0], [1], [0, 0, 1, 1], [], []>} : vector<16x16xf32>, vector<16x128xf32>, vector<16x128xf32> -> vector<16x128xf32>
    %70 = vector.broadcast %54 : vector<1x128xf32> to vector<16x128xf32>
    %71 = arith.mulf %69, %70 : vector<16x128xf32>
    %72 = arith.addf %53, %71 : vector<16x128xf32>
    %73 = vector.extract_strided_slice %33 {offsets = [2, 0], sizes = [1, 128], strides = [1, 1]} : vector<3x128xf32> to vector<1x128xf32>
    %74 = vector.broadcast %73 : vector<1x128xf32> to vector<16x128xf32>
    %75 = arith.mulf %27, %74 : vector<16x128xf32>
    %cst_28 = arith.constant dense<0.000000e+00> : vector<16x16xf32>
    %76 = tpu.matmul %75, %28, %cst_28 {dimension_numbers = #tpu.dot_dimension_numbers<[1], [1], [0], [0], [0, 0, 1, 0], [], []>} : vector<16x128xf32>, vector<16x128xf32>, vector<16x16xf32> -> vector<16x16xf32>
    %cst_29 = arith.constant 0xFF800000 : f32
    %77 = vector.broadcast %cst_29 : f32 to vector<16x16xf32>
    %78 = arith.select %32, %76, %77 : vector<16x16xi1>, vector<16x16xf32>
    %cst_30 = arith.constant dense<0xFF800000> : vector<16xf32>
    %79 = vector.multi_reduction <maximumf>, %78, %cst_30 [1] : vector<16x16xf32> to vector<16xf32>
    %80 = vector.shape_cast %79 : vector<16xf32> to vector<16x1xf32>
    %81 = vector.broadcast %80 : vector<16x1xf32> to vector<16x16xf32>
    %82 = arith.subf %78, %81 : vector<16x16xf32>
    %83 = math.exp %82 : vector<16x16xf32>
    %cst_31 = arith.constant dense<0.000000e+00> : vector<16xf32>
    %84 = vector.multi_reduction <add>, %83, %cst_31 [1] : vector<16x16xf32> to vector<16xf32>
    %85 = vector.shape_cast %84 : vector<16xf32> to vector<16x1xf32>
    %86 = vector.broadcast %85 : vector<16x1xf32> to vector<16x16xf32>
    %87 = arith.divf %83, %86 : vector<16x16xf32>
    %cst_32 = arith.constant dense<0.000000e+00> : vector<16x128xf32>
    %88 = tpu.matmul %87, %29, %cst_32 {dimension_numbers = #tpu.dot_dimension_numbers<[1], [0], [0], [1], [0, 0, 1, 1], [], []>} : vector<16x16xf32>, vector<16x128xf32>, vector<16x128xf32> -> vector<16x128xf32>
    %89 = vector.broadcast %73 : vector<1x128xf32> to vector<16x128xf32>
    %90 = arith.mulf %88, %89 : vector<16x128xf32>
    %91 = arith.addf %72, %90 : vector<16x128xf32>
    %c0_33 = arith.constant 0 : index
    %c0_34 = arith.constant 0 : index
    %92 = vector.load %arg6[%c0_33, %c0_34] : memref<128x128xf32, #tpu.memory_space<vmem>>, vector<128x128xf32>
    %cst_35 = arith.constant dense<0.000000e+00> : vector<16x128xf32>
    %93 = tpu.matmul %91, %92, %cst_35 {dimension_numbers = #tpu.dot_dimension_numbers<[1], [0], [0], [1], [0, 0, 1, 1], [], []>} : vector<16x128xf32>, vector<128x128xf32>, vector<16x128xf32> -> vector<16x128xf32>
    %c0_36 = arith.constant 0 : index
    %c0_37 = arith.constant 0 : index
    %94 = vector.load %arg7[%c0_36, %c0_37] : memref<1x128xf32, #tpu.memory_space<vmem>>, vector<1x128xf32>
    %95 = vector.broadcast %94 : vector<1x128xf32> to vector<16x128xf32>
    %96 = arith.addf %93, %95 : vector<16x128xf32>
    %97 = arith.addf %0, %96 : vector<16x128xf32>
    %c0_38 = arith.constant 0 : index
    %c0_39 = arith.constant 0 : index
    %98 = vector.load %arg8[%c0_38, %c0_39] : memref<1x128xf32, #tpu.memory_space<vmem>>, vector<1x128xf32>
    %c0_40 = arith.constant 0 : index
    %c0_41 = arith.constant 0 : index
    %99 = vector.load %arg9[%c0_40, %c0_41] : memref<1x128xf32, #tpu.memory_space<vmem>>, vector<1x128xf32>
    %cst_42 = arith.constant dense<0.000000e+00> : vector<16xf32>
    %100 = vector.multi_reduction <add>, %97, %cst_42 [1] : vector<16x128xf32> to vector<16xf32>
    %101 = vector.shape_cast %100 : vector<16xf32> to vector<16x1xf32>
    %cst_43 = arith.constant 0.0333333351 : f32
    %102 = vector.broadcast %cst_43 : f32 to vector<16x1xf32>
    %103 = arith.mulf %101, %102 : vector<16x1xf32>
    %104 = arith.mulf %97, %97 : vector<16x128xf32>
    %cst_44 = arith.constant dense<0.000000e+00> : vector<16xf32>
    %105 = vector.multi_reduction <add>, %104, %cst_44 [1] : vector<16x128xf32> to vector<16xf32>
    %106 = vector.shape_cast %105 : vector<16xf32> to vector<16x1xf32>
    %cst_45 = arith.constant 0.0333333351 : f32
    %107 = vector.broadcast %cst_45 : f32 to vector<16x1xf32>
    %108 = arith.mulf %106, %107 : vector<16x1xf32>
    %109 = arith.mulf %103, %103 : vector<16x1xf32>
    %110 = arith.subf %108, %109 : vector<16x1xf32>
    %111 = vector.broadcast %103 : vector<16x1xf32> to vector<16x128xf32>
    %112 = arith.subf %97, %111 : vector<16x128xf32>
    %cst_46 = arith.constant 9.99999974E-6 : f32
    %113 = vector.broadcast %cst_46 : f32 to vector<16x1xf32>
    %114 = arith.addf %110, %113 : vector<16x1xf32>
    %115 = math.rsqrt %114 : vector<16x1xf32>
    %116 = vector.broadcast %115 : vector<16x1xf32> to vector<16x128xf32>
    %117 = arith.mulf %112, %116 : vector<16x128xf32>
    %118 = vector.broadcast %98 : vector<1x128xf32> to vector<16x128xf32>
    %119 = arith.mulf %117, %118 : vector<16x128xf32>
    %120 = vector.broadcast %99 : vector<1x128xf32> to vector<16x128xf32>
    %121 = arith.addf %119, %120 : vector<16x128xf32>
    %c0_47 = arith.constant 0 : index
    %c0_48 = arith.constant 0 : index
    %122 = vector.load %arg10[%c0_47, %c0_48] : memref<128x128xf32, #tpu.memory_space<vmem>>, vector<128x128xf32>
    %cst_49 = arith.constant dense<0.000000e+00> : vector<16x128xf32>
    %123 = tpu.matmul %121, %122, %cst_49 {dimension_numbers = #tpu.dot_dimension_numbers<[1], [0], [0], [1], [0, 0, 1, 1], [], []>} : vector<16x128xf32>, vector<128x128xf32>, vector<16x128xf32> -> vector<16x128xf32>
    %c0_50 = arith.constant 0 : index
    %c0_51 = arith.constant 0 : index
    %124 = vector.load %arg11[%c0_50, %c0_51] : memref<1x128xf32, #tpu.memory_space<vmem>>, vector<1x128xf32>
    %125 = vector.broadcast %124 : vector<1x128xf32> to vector<16x128xf32>
    %126 = arith.addf %123, %125 : vector<16x128xf32>
    %cst_52 = arith.constant 0.000000e+00 : f32
    %127 = vector.broadcast %cst_52 : f32 to vector<16x128xf32>
    %128 = arith.maximumf %126, %127 : vector<16x128xf32>
    %c0_53 = arith.constant 0 : index
    %c0_54 = arith.constant 0 : index
    %129 = vector.load %arg12[%c0_53, %c0_54] : memref<128x128xf32, #tpu.memory_space<vmem>>, vector<128x128xf32>
    %cst_55 = arith.constant dense<0.000000e+00> : vector<16x128xf32>
    %130 = tpu.matmul %128, %129, %cst_55 {dimension_numbers = #tpu.dot_dimension_numbers<[1], [0], [0], [1], [0, 0, 1, 1], [], []>} : vector<16x128xf32>, vector<128x128xf32>, vector<16x128xf32> -> vector<16x128xf32>
    %c0_56 = arith.constant 0 : index
    %c0_57 = arith.constant 0 : index
    %131 = vector.load %arg13[%c0_56, %c0_57] : memref<1x128xf32, #tpu.memory_space<vmem>>, vector<1x128xf32>
    %132 = vector.broadcast %131 : vector<1x128xf32> to vector<16x128xf32>
    %133 = arith.addf %130, %132 : vector<16x128xf32>
    %134 = arith.addf %97, %133 : vector<16x128xf32>
    %c0_58 = arith.constant 0 : index
    %c0_59 = arith.constant 0 : index
    %135 = vector.load %arg14[%c0_58, %c0_59] : memref<16x128xf32, #tpu.memory_space<vmem>>, vector<16x128xf32>
    tpu.vector_store %arg14[%c0_58, %c0_59], %134 {strides = array<i32>} : memref<16x128xf32, #tpu.memory_space<vmem>>, vector<16x128xf32>,
    return
  }
}

</mosaic_0001>

<bundles_post_ra>
// kernel: block_forward.1
= control target key start
LH: loop header
LB: loop body
LE: loop exit
PB: predicated region body
PF: predicated region fallthrough
CT: control target
= control target key end

     0   :  { %19 = vsyncpa [#allocation3], 0  ;;  %s1298_s0 = inlined_call_operand.vmem [shape: f32[16,128], index: 0, kind: input, shape index: {}]   ;;  %s1299_s1 = inlined_call_operand.vmem [shape: f32[16,16], index: 1, kind: input, shape index: {}]   ;;  %s1300_s2 = inlined_call_operand.vmem [shape: f32[3,128], index: 2, kind: input, shape index: {}]   ;;  %s1301_s3 = inlined_call_operand.vmem [shape: f32[1,128], index: 3, kind: input, shape index: {}]   ;;  %s1302_s4 = inlined_call_operand.vmem [shape: f32[1,128], index: 4, kind: input, shape index: {}]   ;;  %s1303_s5 = inlined_call_operand.hbm [shape: f32[128,384], index: 5, kind: input, shape index: {}]   ;;  %s1304_s6 = inlined_call_operand.hbm [shape: f32[128,128], index: 6, kind: input, shape index: {}]   ;;  %s1305_s7 = inlined_call_operand.vmem [shape: f32[1,128], index: 7, kind: input, shape index: {}]   ;;  %s1306_s8 = inlined_call_operand.vmem [shape: f32[1,128], index: 8, kind: input, shape index: {}]   ;;  %s1307_s9 = inlined_call_operand.vmem [shape: f32[1,128], index: 9, kind: input, shape index: {}]   ;;  %s1308_s10 = inlined_call_operand.hbm [shape: f32[128,128], index: 10, kind: input, shape index: {}]   ;;  %s1309_s11 = inlined_call_operand.vmem [shape: f32[1,128], index: 11, kind: input, shape index: {}]   ;;  %s1310_s12 = inlined_call_operand.hbm [shape: f32[128,128], index: 12, kind: input, shape index: {}]   ;;  %s1311_s13 = inlined_call_operand.vmem [shape: f32[1,128], index: 13, kind: input, shape index: {}]   ;;  %s1312_s14 = inlined_call_operand.hbm [shape: f32[16,128], index: 14, kind: output, shape index: {}]  }
   0x1   :  { %20 = vsyncpa [#allocation6], 0 }
   0x2   :  { %21 = vsyncpa [#allocation9], 0  ;;  %s50_s15 = sshll.u32 %s1304_s6, 4  ;;  %s51_s15 = int_to_ptr.hbm [resolvable:$true] %s50_s15 }
   0x3   :  { %22 = vsyncpa [#allocation4], 0  ;;  %s1015_s16 = smov [#allocation5]   ;;  %s37_s20 = sshll.u32 %s1303_s5, 4  ;;  %s38_s20 = int_to_ptr.hbm [resolvable:$true] %s37_s20 }
   0x4   :  { %s52_s17 = sshll.u32 %s1015_s16, 4  ;;  %s1016_s21 = smov 128   ;;  %s53_s17 = int_to_ptr.vmem [resolvable:$true] %s52_s17 }
   0x5   :  { %s1017_s22 = smov 8   ;;  %s1018_s23 = smov [#allocation2]  }
   0x6   :  { %58 = dma.hbm_to_vmem [thread:$0]  %s51_s15, 2048, %s53_s17, [#allocation6], %s1016_s21, %s1016_s21, %s1017_s22  }
   0x7   :  { %s39_s24 = sshll.u32 %s1018_s23, 4  ;;  %s1019_s6 = smov 384   ;;  %s40_s24 = int_to_ptr.vmem [resolvable:$true] %s39_s24 }
   0x8   :  { %s1020_s25 = smov 24   ;;  %s69_s28 = sshll.u32 %s1308_s10, 4  ;;  %s70_s28 = int_to_ptr.hbm [resolvable:$true] %s69_s28 }
   0x9   :  { %45 = dma.hbm_to_vmem [thread:$0]  %s38_s20, 6144, %s40_s24, [#allocation3], %s1019_s6, %s1019_s6, %s1020_s25  }
   0xa   :  { %s1021_s29 = smov [#allocation7]   ;;  %s84_s18 = sshll.u32 %s1310_s12, 4  ;;  %s85_s18 = int_to_ptr.hbm [resolvable:$true] %s84_s18 }
   0xb   :  { %s71_s5 = sshll.u32 %s1021_s29, 4  ;;  %s1022_s15 = smov [#allocation8]   ;;  %s72_s5 = int_to_ptr.vmem [resolvable:$true] %s71_s5 }
   0xc   :  { %77 = dma.hbm_to_vmem [thread:$0]  %s70_s28, 2048, %s72_s5, [#allocation6], %s1016_s21, %s1016_s21, %s1017_s22  }
   0xd   :  { %s86_s17 = sshll.u32 %s1022_s15, 4  ;;  %s87_s17 = int_to_ptr.vmem [resolvable:$true] %s86_s17 }
   0xe   :  { %92 = dma.hbm_to_vmem [thread:$0]  %s85_s18, 2048, %s87_s17, [#allocation9], %s1016_s21, %s1016_s21, %s1017_s22  }
   0xf   :  { %1007 = dma.done.wait [#allocation3], 6144  }
  0x10   :  { %1008 = vsyncadd [#allocation3], 4294961152 }
  0x11   :  { %1009 = dma.done.wait [#allocation6], 4096  }
  0x12   :  { %1010 = vsyncadd [#allocation6], 4294963200 }
  0x13   :  { %1011 = dma.done.wait [#allocation9], 2048  }
  0x14   :  { %1012 = vsyncadd [#allocation9], 4294965248  ;;  %v1123_v0 = vld [vmem:[%s1298_s0 + $0x8] sm:$0xff]  ;;  %v1128_v1 = vld [vmem:[%s1298_s0] sm:$0xff]  ;;  %vm319_vm7 = vcmask 130048   ;;  %s1023_s15 = smov [#allocation10]  }
  0x15   :  { %117 = vadd.xlane.f32.xlu1 %v1123_v0  ;;  %115 = vadd.xlane.f32.xlu0 %v1128_v1  ;;  %v122_v2 = vmul.f32 %v1123_v0, %v1123_v0  ;;  %v121_v3 = vmul.f32 %v1128_v1, %v1128_v1  ;;  %v214_v4 = vld [vmem:[#allocation2 + $0x168] sm:$0xff]  ;;  %v215_v5 = vld [vmem:[#allocation2 + $0x170] sm:$0xff]  ;;  %v216_v6 = vld [vmem:[#allocation2 + $0x178] sm:$0xff]  ;;  %s818_s12 = sshll.u32 %s1312_s14, 4  ;;  %s819_s12 = int_to_ptr.hbm [resolvable:$true] %s818_s12 }
  0x16   :  { %217 = vmatpush.msra.mxu0 %v214_v4  ;;  %240 = vmatpush.msra.mxu1 %v215_v5  ;;  %v211_v7 = vld [vmem:[#allocation2 + $0x150] sm:$0xff]  ;;  %v212_v8 = vld [vmem:[#allocation2 + $0x158] sm:$0xff]  ;;  %v213_v9 = vld [vmem:[#allocation2 + $0x160] sm:$0xff] }
  0x17   :  { %263 = vmatpush.msra.mxu2 %v216_v6  ;;  %v208_v10 = vld [vmem:[#allocation2 + $0x138] sm:$0xff]  ;;  %v209_v11 = vld [vmem:[#allocation2 + $0x140] sm:$0xff]  ;;  %v210_v12 = vld [vmem:[#allocation2 + $0x148] sm:$0xff] }
  0x18   :  { %218 = vmatpush.msra.mxu0 %v211_v7  ;;  %241 = vmatpush.msra.mxu1 %v212_v8  ;;  %v205_v13 = vld [vmem:[#allocation2 + $0x120] sm:$0xff]  ;;  %v206_v14 = vld [vmem:[#allocation2 + $0x128] sm:$0xff]  ;;  %v207_v15 = vld [vmem:[#allocation2 + $0x130] sm:$0xff] }
  0x19   :  { %264 = vmatpush.msra.mxu2 %v213_v9  ;;  %v202_v16 = vld [vmem:[#allocation2 + $0x108] sm:$0xff]  ;;  %v203_v17 = vld [vmem:[#allocation2 + $0x110] sm:$0xff]  ;;  %v204_v18 = vld [vmem:[#allocation2 + $0x118] sm:$0xff] }
  0x1a   :  { %219 = vmatpush.msra.mxu0 %v208_v10  ;;  %242 = vmatpush.msra.mxu1 %v209_v11  ;;  %v199_v19 = vld [vmem:[#allocation2 + $0xf0] sm:$0xff]  ;;  %v200_v20 = vld [vmem:[#allocation2 + $0xf8] sm:$0xff]  ;;  %v201_v21 = vld [vmem:[#allocation2 + $0x100] sm:$0xff] }
  0x1b   :  { %265 = vmatpush.msra.mxu2 %v210_v12  ;;  %v196_v22 = vld [vmem:[#allocation2 + $0xd8] sm:$0xff]  ;;  %v197_v23 = vld [vmem:[#allocation2 + $0xe0] sm:$0xff]  ;;  %v198_v24 = vld [vmem:[#allocation2 + $0xe8] sm:$0xff] }
  0x1c   :  { %220 = vmatpush.msra.mxu0 %v205_v13  ;;  %243 = vmatpush.msra.mxu1 %v206_v14  ;;  %v193_v25 = vld [vmem:[#allocation2 + $0xc0] sm:$0xff]  ;;  %v194_v26 = vld [vmem:[#allocation2 + $0xc8] sm:$0xff]  ;;  %v195_v27 = vld [vmem:[#allocation2 + $0xd0] sm:$0xff] }
  0x1d   :  { %125 = vadd.xlane.f32.xlu1 %v122_v2  ;;  %123 = vadd.xlane.f32.xlu0 %v121_v3  ;;  %v190_v28 = vld [vmem:[#allocation2 + $0xa8] sm:$0xff]  ;;  %v191_v29 = vld [vmem:[#allocation2 + $0xb0] sm:$0xff]  ;;  %v192_v30 = vld [vmem:[#allocation2 + $0xb8] sm:$0xff] }
  0x1e   :  { %266 = vmatpush.msra.mxu2 %v207_v15  ;;  %221 = vmatpush.msra.mxu0 %v202_v16  ;;  %v187_v31 = vld [vmem:[#allocation2 + $0x90] sm:$0xff]  ;;  %v188_v32 = vld [vmem:[#allocation2 + $0x98] sm:$0xff]  ;;  %v189_v33 = vld [vmem:[#allocation2 + $0xa0] sm:$0xff] }
  0x1f   :  { %244 = vmatpush.msra.mxu1 %v203_v17  ;;  %v184_v34 = vld [vmem:[#allocation2 + $0x78] sm:$0xff]  ;;  %v185_v35 = vld [vmem:[#allocation2 + $0x80] sm:$0xff]  ;;  %v186_v36 = vld [vmem:[#allocation2 + $0x88] sm:$0xff] }
  0x20   :  { %267 = vmatpush.msra.mxu2 %v204_v18  ;;  %222 = vmatpush.msra.mxu0 %v199_v19  ;;  %v181_v37 = vld [vmem:[#allocation2 + $0x60] sm:$0xff]  ;;  %v182_v38 = vld [vmem:[#allocation2 + $0x68] sm:$0xff]  ;;  %v183_v39 = vld [vmem:[#allocation2 + $0x70] sm:$0xff] }
  0x21   :  { %245 = vmatpush.msra.mxu1 %v200_v20  ;;  %v178_v40 = vld [vmem:[#allocation2 + $0x48] sm:$0xff]  ;;  %v179_v41 = vld [vmem:[#allocation2 + $0x50] sm:$0xff]  ;;  %v180_v42 = vld [vmem:[#allocation2 + $0x58] sm:$0xff] }
  0x22   :  { %268 = vmatpush.msra.mxu2 %v201_v21  ;;  %223 = vmatpush.msra.mxu0 %v196_v22  ;;  %v175_v45 = vld [vmem:[#allocation2 + $0x30] sm:$0xff]  ;;  %v176_v46 = vld [vmem:[#allocation2 + $0x38] sm:$0xff]  ;;  %v177_v47 = vld [vmem:[#allocation2 + $0x40] sm:$0xff] }
  0x23   :  { %246 = vmatpush.msra.mxu1 %v197_v23  ;;  %v172_v48 = vld [vmem:[#allocation2 + $0x18] sm:$0xff]  ;;  %v173_v50 = vld [vmem:[#allocation2 + $0x20] sm:$0xff]  ;;  %v174_v51 = vld [vmem:[#allocation2 + $0x28] sm:$0xff] }
  0x24   :  { %269 = vmatpush.msra.mxu2 %v198_v24  ;;  %224 = vmatpush.msra.mxu0 %v193_v25  ;;  %v169_v52 = vld [vmem:[#allocation2] sm:$0xff]  ;;  %v170_v54 = vld [vmem:[#allocation2 + $0x8] sm:$0xff]  ;;  %v171_v55 = vld [vmem:[#allocation2 + $0x10] sm:$0xff] }
  0x25   :  { %247 = vmatpush.msra.mxu1 %v194_v26  ;;  %v848_v17 = vld [vmem:[%s1301_s3] ss:$0 sm:$0xff] }
  0x26   :  { %270 = vmatpush.msra.mxu2 %v195_v27  ;;  %225 = vmatpush.msra.mxu0 %v190_v28  ;;  %v849_v20 = vld [vmem:[%s1302_s4] ss:$0 sm:$0xff] }
  0x27   :  { %248 = vmatpush.msra.mxu1 %v191_v29 }
  0x28   :  { %271 = vmatpush.msra.mxu2 %v192_v30  ;;  %226 = vmatpush.msra.mxu0 %v187_v31  ;;  %v1147_v30 = vld [vmem:[%s1300_s2] sm:$0x7] }
  0x29   :  { %249 = vmatpush.msra.mxu1 %v188_v32 }
  0x2a   :  { %272 = vmatpush.msra.mxu2 %v189_v33  ;;  %227 = vmatpush.msra.mxu0 %v184_v34  ;;  %v1152_v33 = vperm.slane %v1147_v30, 2  ;;  %v1155_v34 = vperm.slane %v1147_v30, 0 }
  0x2b   :  { %250 = vmatpush.msra.mxu1 %v185_v35 }
  0x2c   :  { %273 = vmatpush.msra.mxu2 %v186_v36  ;;  %228 = vmatpush.msra.mxu0 %v181_v37 }
  0x2d   :  { %251 = vmatpush.msra.mxu1 %v182_v38 }
  0x2e   :  { %274 = vmatpush.msra.mxu2 %v183_v39  ;;  %229 = vmatpush.msra.mxu0 %v178_v40 }
  0x2f   :  { %252 = vmatpush.msra.mxu1 %v179_v41  ;;  %v1170_v41 = vld [vmem:[%s1299_s1] sm:$0xff] }
  0x30   :  { %275 = vmatpush.msra.mxu2 %v180_v42  ;;  %230 = vmatpush.msra.mxu0 %v175_v45  ;;  %vm288_vm6 = vcmp.ne.f32.partialorder %v1170_v41, 0.0  ;;  %v1179_v45 = vld [vmem:[%s1299_s1 + $0x8] sm:$0xff] }
  0x31   :  { %253 = vmatpush.msra.mxu1 %v176_v46  ;;  %vm289_vm8 = vcmp.ne.f32.partialorder %v1179_v45, 0.0 }
  0x32   :  { %276 = vmatpush.msra.mxu2 %v177_v47  ;;  %231 = vmatpush.msra.mxu0 %v172_v48 }
  0x33   :  { %254 = vmatpush.msra.mxu1 %v173_v50 }
  0x34   :  { %277 = vmatpush.msra.mxu2 %v174_v51  ;;  %232 = vmatpush.msra.mxu0 %v169_v52 }
  0x35   :  { %255 = vmatpush.msra.mxu1 %v170_v54 }
  0x36   :  { %278 = vmatpush.msra.mxu2 %v171_v55 }
  0x88   :  { %v118_v43 = vpop.xlane.xlu1 %117  ;;  %v116_v44 = vpop.xlane.xlu0 %115 }
  0x89   :  { %v120_v49 = vmul.f32 0.033333335, %v118_v43  ;;  %v119_v53 = vmul.f32 0.033333335, %v116_v44 }
  0x8b   :  { %v130_v56 = vmul.f32 %v120_v49, %v120_v49  ;;  %v129_v59 = vmul.f32 %v119_v53, %v119_v53  ;;  %v133_v16 = vsub.f32 %v1128_v1, %v119_v53  ;;  %v134_v22 = vsub.f32 %v1123_v0, %v120_v49 }
  0x90   :  { %v126_v57 = vpop.xlane.xlu1 %125  ;;  %v124_v58 = vpop.xlane.xlu0 %123 }
  0x91   :  { %v128_v60 = vmul.f32 0.033333335, %v126_v57  ;;  %v127_v61 = vmul.f32 0.033333335, %v124_v58 }
  0x93   :  { %v132_v62 = vsub.f32 %v128_v60, %v130_v56  ;;  %v131_v63 = vsub.f32 %v127_v61, %v129_v59 }
  0x95   :  { %v136_v2 = vadd.f32 1e-05, %v132_v62  ;;  %v135_v3 = vadd.f32 1e-05, %v131_v63 }
  0x97   :  { %855 = vrsqrt.f32 %v136_v2  ;;  %vm143_vm2 = vweird.f32 %v135_v3  ;;  %vm153_vm4 = vweird.f32 %v136_v2 }
  0x98   :  { %857 = vrsqrt.f32 %v135_v3 }
  0x9d   :  { %v856_v4 = vpop.eup %855 }
  0x9e   :  { %v858_v5 = vpop.eup %857  ;;  %v148_v6 = vmul.f32 %v856_v4, %v136_v2  ;;  %vm154_vm1 = vweird.f32 %v856_v4 }
  0x9f   :  { %v138_v7 = vmul.f32 %v858_v5, %v135_v3  ;;  %vm144_vm0 = vweird.f32 %v858_v5  ;;  %vm155_vm5 = vmor %vm153_vm4, %vm154_vm1 }
  0xa0   :  { %v149_v8 = vmul.f32 %v856_v4, %v148_v6  ;;  %vm145_vm3 = vmor %vm143_vm2, %vm144_vm0 }
  0xa1   :  { %v139_v9 = vmul.f32 %v858_v5, %v138_v7 }
  0xa2   :  { %v150_v10 = vmul.f32 0.5, %v149_v8 }
  0xa3   :  { %v140_v11 = vmul.f32 0.5, %v139_v9 }
  0xa4   :  { %v151_v12 = vsub.f32 1.5, %v150_v10 }
  0xa5   :  { %v141_v13 = vsub.f32 1.5, %v140_v11 }
  0xa6   :  { %v152_v14 = vmul.f32 %v856_v4, %v151_v12 }
  0xa7   :  { %v142_v15 = vmul.f32 %v858_v5, %v141_v13 }
  0xa8   :  { %v156_v21 = vsel %vm155_vm5, %v856_v4, %v152_v14 }
  0xa9   :  { %v146_v18 = vsel %vm145_vm3, %v858_v5, %v142_v15  ;;  %v158_v25 = vmul.f32 %v156_v21, %v134_v22 }
  0xaa   :  { %v157_v19 = vmul.f32 %v146_v18, %v133_v16 }
  0xab   :  { %v163_v26 = vmul.f32 %v848_v17, %v158_v25 }
  0xac   :  { %v162_v23 = vmul.f32 %v848_v17, %v157_v19 }
  0xad   :  { %v168_v27 = vadd.f32 %v849_v20, %v163_v26 }
  0xae   :  { %v167_v24 = vadd.f32 %v849_v20, %v162_v23 }
  0xb0   :  { %233 = vmatmul.f32.vlgmr.msra.gmra.mxu0 %v167_v24  ;;  %256 = vmatmul.f32.vlgmr.msra.gmra.mxu1 %v167_v24 }
  0xb1   :  { %279 = vmatmul.f32.vlgmr.msra.gmra.mxu2 %v167_v24  ;;  %v1193_v24 = vperm.slane %v1147_v30, 1 }
  0xb8   :  { %236 = vmatmul.f32.gmra.mxu0 %v168_v27  ;;  %259 = vmatmul.f32.gmra.mxu1 %v168_v27 }
  0xb9   :  { %282 = vmatmul.f32.gmra.mxu2 %v168_v27 }
 0x12d   :  { %v257_v28 = vpop.f32.mrf.mxu1  ;;  %v1149_v32 = vpop.f32.mrf.mxu0 }
 0x12e   :  { %v511_v35 = vmul.f32 %v1152_v33, %v1149_v32  ;;  %v292_v37 = vmul.f32 %v1155_v34, %v1149_v32  ;;  %v402_v25 = vmul.f32 %v1193_v24, %v1149_v32 }
 0x134   :  { %v280_v29 = vpop.f32.mrf.mxu2 }
 0x135   :  { %v260_v31 = vpop.f32.mrf.mxu1  ;;  %v1161_v38 = vpop.f32.mrf.mxu0 }
 0x136   :  { %308 = vmatpush.xpose.msra.mxu3 %v260_v31  ;;  %527 = vmatpush.xpose.msrb.mxu1 %v260_v31  ;;  %v293_v39 = vmul.f32 %v1155_v34, %v1161_v38  ;;  %v512_v40 = vmul.f32 %v1152_v33, %v1161_v38  ;;  %v403_v26 = vmul.f32 %v1193_v24, %v1161_v38 }
 0x13a   :  { %309 = vmatpush.xpose.msra.mxu3 %v257_v28  ;;  %528 = vmatpush.xpose.msrb.mxu1 %v257_v28 }
 0x13c   :  { %v283_v36 = vpop.f32.mrf.mxu2 }
 0x13d   :  { %497 = vmatpush.msrb.mxu2 %v283_v36  ;;  %310 = vmatmul.f32.vlgmr.msra.gmra.mxu3 %v292_v37 }
 0x13e   :  { %388 = vmatpush.msrb.mxu3 %v283_v36  ;;  %529 = vmatmul.f32.vlgmr.msrb.gmra.mxu1 %v511_v35 }
 0x13f   :  { %498 = vmatpush.msrb.mxu2 %v280_v29 }
 0x140   :  { %389 = vmatpush.msrb.mxu3 %v280_v29 }
 0x141   :  { %606 = vmatpush.msra.mxu2 %v283_v36 }
 0x142   :  { %418 = vmatpush.xpose.msra.mxu3 %v260_v31 }
 0x143   :  { %607 = vmatpush.msra.mxu2 %v280_v29 }
 0x145   :  { %313 = vmatmul.f32.gmra.mxu3 %v293_v39 }
 0x146   :  { %419 = vmatpush.xpose.msra.mxu3 %v257_v28  ;;  %532 = vmatmul.f32.gmra.mxu1 %v512_v40 }
 0x1bb   :  { %v530_v59 = vpop.f32.mrf.mxu1 }
 0x1bc   :  { %v536_v60 = vsel %vm288_vm6, %v530_v59, -inf }
 0x1bd   :  { %v538_v61 = vsel %vm319_vm7, %v536_v60, -inf }
 0x1c0   :  { %v311_v42 = vpop.f32.mrf.mxu3 }
 0x1c1   :  { %v317_v43 = vsel %vm288_vm6, %v311_v42, -inf }
 0x1c2   :  { %v320_v44 = vsel %vm319_vm7, %v317_v43, -inf }
 0x1c3   :  { %321 = vmax.xlane.f32.xlu2 %v320_v44  ;;  %v533_v37 = vpop.f32.mrf.mxu1 }
 0x1c4   :  { %v537_v39 = vsel %vm289_vm8, %v533_v37, -inf }
 0x1c5   :  { %v541_v42 = vsel %vm319_vm7, %v537_v39, -inf }
 0x1c8   :  { %v314_v46 = vpop.f32.mrf.mxu3 }
 0x1c9   :  { %v318_v47 = vsel %vm289_vm8, %v314_v46, -inf }
 0x1ca   :  { %v323_v48 = vsel %vm319_vm7, %v318_v47, -inf }
 0x1cb   :  { %324 = vmax.xlane.f32.xlu2 %v323_v48 }
 0x236   :  { %v322_v49 = vpop.xlane.xlu2 %321 }
 0x237   :  { %v326_v50 = vsub.f32 %v317_v43, %v322_v49 }
 0x239   :  { %v328_v51 = vmul.f32 1.442695, %v326_v50 }
 0x23b   :  { %859 = vpow2.f32 %v328_v51 }
 0x23e   :  { %v325_v52 = vpop.xlane.xlu2 %324 }
 0x23f   :  { %v327_v53 = vsub.f32 %v318_v47, %v325_v52 }
 0x241   :  { %v860_v54 = vpop.eup %859  ;;  %v330_v55 = vmul.f32 1.442695, %v327_v53 }
 0x242   :  { %v332_v56 = vsel %vm319_vm7, %v860_v54, 0.0 }
 0x243   :  { %861 = vpow2.f32 %v330_v55  ;;  %333 = vadd.xlane.f32.xlu0 %v332_v56 }
 0x249   :  { %v862_v57 = vpop.eup %861 }
 0x24a   :  { %v335_v58 = vsel %vm319_vm7, %v862_v57, 0.0 }
 0x24b   :  { %336 = vadd.xlane.f32.xlu1 %v335_v58 }
 0x253   :  { %539 = vmax.xlane.f32.xlu1 %v538_v61 }
 0x2b6   :  { %v334_v62 = vpop.xlane.xlu0 %333 }
 0x2b7   :  { %863 = vrcp.f32 %v334_v62  ;;  %v349_v5 = vand.u32 2147483648, %v334_v62  ;;  %v347_v7 = vand.u32 2147483647, %v334_v62  ;;  %vm343_vm10 = vweird.f32 %v334_v62 }
 0x2b9   :  { %v350_v10 = vor.u32 1.1754944e-38, %v349_v5  ;;  %vm348_vm12 = vcmp.eq.f32.partialorder %v347_v7, 8.507059e+37 }
 0x2bd   :  { %v864_v63 = vpop.eup %863 }
 0x2be   :  { %v339_v2 = vmul.f32 %v864_v63, %v334_v62  ;;  %v337_v3 = vpop.xlane.xlu1 %336  ;;  %vm344_vm9 = vweird.f32 %v864_v63 }
 0x2bf   :  { %865 = vrcp.f32 %v337_v3  ;;  %vm345_vm11 = vmor %vm343_vm10, %vm344_vm9  ;;  %v364_v16 = vand.u32 2147483648, %v337_v3  ;;  %v362_v18 = vand.u32 2147483647, %v337_v3  ;;  %vm358_vm14 = vweird.f32 %v337_v3 }
 0x2c0   :  { %v340_v4 = vsub.f32 1.0, %v339_v2 }
 0x2c1   :  { %v365_v20 = vor.u32 1.1754944e-38, %v364_v16  ;;  %vm363_vm0 = vcmp.eq.f32.partialorder %v362_v18, 8.507059e+37 }
 0x2c2   :  { %v341_v6 = vmul.f32 %v864_v63, %v340_v4 }
 0x2c4   :  { %v342_v8 = vadd.f32 %v864_v63, %v341_v6 }
 0x2c5   :  { %v866_v9 = vpop.eup %865 }
 0x2c6   :  { %v354_v11 = vmul.f32 %v866_v9, %v337_v3  ;;  %v346_v12 = vsel %vm345_vm11, %v864_v63, %v342_v8  ;;  %vm359_vm13 = vweird.f32 %v866_v9  ;;  %v540_v29 = vpop.xlane.xlu1 %539 }
 0x2c7   :  { %v351_v13 = vsel %vm348_vm12, %v350_v10, %v346_v12  ;;  %vm360_vm15 = vmor %vm358_vm14, %vm359_vm13  ;;  %v544_v35 = vsub.f32 %v536_v60, %v540_v29  ;;  %v634_v10 = vld [vmem:[#allocation5 + $0x78] sm:$0xff] }
 0x2c8   :  { %v355_v14 = vsub.f32 1.0, %v354_v11  ;;  %v352_v15 = vmul.f32 %v860_v54, %v351_v13  ;;  %v633_v11 = vld [vmem:[#allocation5 + $0x70] sm:$0xff] }
 0x2c9   :  { %v546_v32 = vmul.f32 1.442695, %v544_v35 }
 0x2ca   :  { %v356_v17 = vmul.f32 %v866_v9, %v355_v14  ;;  %833 = vmatmul.msk.f32.vlgmr.msrb.gmra.mxu3 %vm319_vm7, %v352_v15  ;;  %v632_v14 = vld [vmem:[#allocation5 + $0x68] sm:$0xff] }
 0x2cb   :  { %867 = vpow2.f32 %v546_v32  ;;  %639 = vmatpush.msrb.mxu3 %v634_v10 }
 0x2cc   :  { %v357_v19 = vadd.f32 %v866_v9, %v356_v17 }
 0x2cd   :  { %640 = vmatpush.msrb.mxu3 %v633_v11 }
 0x2ce   :  { %v361_v21 = vsel %vm360_vm15, %v866_v9, %v357_v19 }
 0x2cf   :  { %v366_v22 = vsel %vm363_vm0, %v365_v20, %v361_v21  ;;  %v631_v20 = vld [vmem:[#allocation5 + $0x60] sm:$0xff]  ;;  %641 = vmatpush.msrb.mxu3 %v632_v14 }
 0x2d0   :  { %v367_v23 = vmul.f32 %v862_v57, %v366_v22 }
 0x2d1   :  { %v1212_v41 = vpop.eup %867  ;;  %642 = vmatpush.msrb.mxu3 %v631_v20 }
 0x2d2   :  { %834 = vmatmul.msk.f32.gmra.mxu3 %vm319_vm7, %v367_v23  ;;  %v550_v44 = vsel %vm319_vm7, %v1212_v41, 0.0 }
 0x2da   :  { %420 = vmatmul.f32.vlgmr.msra.gmra.mxu3 %v402_v25  ;;  %v630_v25 = vld [vmem:[#allocation5 + $0x58] sm:$0xff] }
 0x2db   :  { %643 = vmatpush.msrb.mxu3 %v630_v25  ;;  %v733_v25 = vld [vmem:[#allocation7 + $0x68] sm:$0xff] }
 0x2e2   :  { %423 = vmatmul.f32.gmra.mxu3 %v403_v26 }
 0x34d   :  { %v1199_v27 = vpop.f32.mrf.mxu3 }
 0x355   :  { %v1201_v28 = vpop.f32.mrf.mxu3 }
 0x356   :  { %v398_v14 = vmul.f32 %v1201_v28, %v1155_v34 }
 0x35d   :  { %v421_v31 = vpop.f32.mrf.mxu3 }
 0x35e   :  { %v427_v36 = vsel %vm288_vm6, %v421_v31, -inf }
 0x35f   :  { %v429_v30 = vsel %vm319_vm7, %v427_v36, -inf }
 0x360   :  { %430 = vmax.xlane.f32.xlu2 %v429_v30 }
 0x365   :  { %v424_v38 = vpop.f32.mrf.mxu3 }
 0x366   :  { %v428_v40 = vsel %vm289_vm8, %v424_v38, -inf }
 0x367   :  { %v432_v43 = vsel %vm319_vm7, %v428_v40, -inf }
 0x368   :  { %542 = vmax.xlane.f32.xlu2 %v541_v42  ;;  %433 = vmax.xlane.f32.xlu0 %v432_v43 }
 0x370   :  { %551 = vadd.xlane.f32.xlu2 %v550_v44 }
 0x3d3   :  { %v431_v46 = vpop.xlane.xlu2 %430 }
 0x3d4   :  { %v435_v47 = vsub.f32 %v427_v36, %v431_v46 }
 0x3d6   :  { %v437_v48 = vmul.f32 1.442695, %v435_v47 }
 0x3d8   :  { %869 = vpow2.f32 %v437_v48 }
 0x3db   :  { %v543_v49 = vpop.xlane.xlu2 %542  ;;  %v434_v50 = vpop.xlane.xlu0 %433 }
 0x3dc   :  { %v545_v45 = vsub.f32 %v537_v39, %v543_v49  ;;  %v436_v51 = vsub.f32 %v428_v40, %v434_v50 }
 0x3de   :  { %v870_v52 = vpop.eup %869  ;;  %v548_v53 = vmul.f32 1.442695, %v545_v45  ;;  %v439_v54 = vmul.f32 1.442695, %v436_v51 }
 0x3df   :  { %v441_v55 = vsel %vm319_vm7, %v870_v52, 0.0 }
 0x3e0   :  { %871 = vpow2.f32 %v548_v53  ;;  %442 = vadd.xlane.f32.xlu0 %v441_v55 }
 0x3e1   :  { %873 = vpow2.f32 %v439_v54 }
 0x3e3   :  { %v1225_v60 = vpop.xlane.xlu2 %551 }
 0x3e4   :  { %v567_v40 = vand.u32 2147483648, %v1225_v60  ;;  %vm561_vm11 = vweird.f32 %v1225_v60  ;;  %v565_v43 = vand.u32 2147483647, %v1225_v60 }
 0x3e6   :  { %v1217_v56 = vpop.eup %871  ;;  %v568_v48 = vor.u32 1.1754944e-38, %v567_v40  ;;  %vm566_vm13 = vcmp.eq.f32.partialorder %v565_v43, 8.507059e+37  ;;  %v721_v40 = vld [vmem:[#allocation7 + $0x8] sm:$0xff] }
 0x3e7   :  { %v1219_v57 = vpop.eup %873  ;;  %v553_v58 = vsel %vm319_vm7, %v1217_v56, 0.0 }
 0x3e8   :  { %554 = vadd.xlane.f32.xlu0 %v553_v58  ;;  %v444_v59 = vsel %vm319_vm7, %v1219_v57, 0.0  ;;  %v629_v58 = vld [vmem:[#allocation5 + $0x50] sm:$0xff] }
 0x3e9   :  { %445 = vadd.xlane.f32.xlu1 %v444_v59  ;;  %644 = vmatpush.msrb.mxu3 %v629_v58  ;;  %v628_v59 = vld [vmem:[#allocation5 + $0x48] sm:$0xff] }
 0x3ea   :  { %v778_v58 = vld [vmem:[#allocation8 + $0x68] sm:$0xff] }
 0x3eb   :  { %645 = vmatpush.msrb.mxu3 %v628_v59 }
 0x453   :  { %v443_v61 = vpop.xlane.xlu0 %442 }
 0x454   :  { %875 = vrcp.f32 %v443_v61  ;;  %v458_v7 = vand.u32 2147483648, %v443_v61  ;;  %v456_v9 = vand.u32 2147483647, %v443_v61  ;;  %vm452_vm2 = vweird.f32 %v443_v61 }
 0x455   :  { %877 = vrcp.f32 %v1225_v60 }
 0x456   :  { %v459_v13 = vor.u32 1.1754944e-38, %v458_v7  ;;  %vm457_vm4 = vcmp.eq.f32.partialorder %v456_v9, 8.507059e+37 }
 0x45a   :  { %v876_v62 = vpop.eup %875 }
 0x45b   :  { %v1228_v63 = vpop.eup %877  ;;  %v448_v2 = vmul.f32 %v876_v62, %v443_v61  ;;  %v1230_v3 = vpop.xlane.xlu0 %554  ;;  %vm453_vm1 = vweird.f32 %v876_v62  ;;  %v626_v61 = vld [vmem:[#allocation5 + $0x38] sm:$0xff] }
 0x45c   :  { %v446_v4 = vpop.xlane.xlu1 %445  ;;  %v557_v6 = vmul.f32 %v1228_v63, %v1225_v60  ;;  %vm454_vm3 = vmor %vm452_vm2, %vm453_vm1  ;;  %vm562_vm8 = vweird.f32 %v1228_v63  ;;  %v582_v45 = vand.u32 2147483648, %v1230_v3  ;;  %vm576_vm15 = vweird.f32 %v1230_v3  ;;  %v627_v60 = vld [vmem:[#allocation5 + $0x40] sm:$0xff] }
 0x45d   :  { %v449_v5 = vsub.f32 1.0, %v448_v2  ;;  %879 = vrcp.f32 %v446_v4  ;;  %v473_v29 = vand.u32 2147483648, %v446_v4  ;;  %v471_v36 = vand.u32 2147483647, %v446_v4  ;;  %vm563_vm12 = vmor %vm561_vm11, %vm562_vm8  ;;  %646 = vmatpush.msrb.mxu3 %v627_v60  ;;  %v622_v2 = vld [vmem:[#allocation5 + $0x18] sm:$0xff]  ;;  %v777_v60 = vld [vmem:[#allocation8 + $0x60] sm:$0xff] }
 0x45e   :  { %881 = vrcp.f32 %v1230_v3  ;;  %v558_v16 = vsub.f32 1.0, %v557_v6  ;;  %vm467_vm6 = vweird.f32 %v446_v4  ;;  %v583_v54 = vor.u32 1.1754944e-38, %v582_v45 }
 0x45f   :  { %v450_v8 = vmul.f32 %v876_v62, %v449_v5  ;;  %v474_v37 = vor.u32 1.1754944e-38, %v473_v29  ;;  %vm472_vm10 = vcmp.eq.f32.partialorder %v471_v36, 8.507059e+37  ;;  %647 = vmatpush.msrb.mxu3 %v626_v61  ;;  %v731_v29 = vld [vmem:[#allocation7 + $0x58] sm:$0xff] }
 0x460   :  { %v559_v26 = vmul.f32 %v1228_v63, %v558_v16  ;;  %v727_v36 = vld [vmem:[#allocation7 + $0x38] sm:$0xff] }
 0x461   :  { %v451_v12 = vadd.f32 %v876_v62, %v450_v8  ;;  %v397_v8 = vmul.f32 %v1199_v27, %v1155_v34  ;;  %v850_v27 = vld [vmem:[%s1305_s7] ss:$0 sm:$0xff] }
 0x462   :  { %v560_v32 = vadd.f32 %v1228_v63, %v559_v26  ;;  %v732_v26 = vld [vmem:[#allocation7 + $0x60] sm:$0xff] }
 0x463   :  { %v880_v15 = vpop.eup %879  ;;  %v455_v17 = vsel %vm454_vm3, %v876_v62, %v451_v12  ;;  %v624_v62 = vld [vmem:[#allocation5 + $0x28] sm:$0xff] }
 0x464   :  { %v463_v18 = vmul.f32 %v880_v15, %v446_v4  ;;  %v460_v19 = vsel %vm457_vm4, %v459_v13, %v455_v17  ;;  %v882_v21 = vpop.eup %881  ;;  %vm468_vm5 = vweird.f32 %v880_v15  ;;  %v564_v46 = vsel %vm563_vm12, %v1228_v63, %v560_v32  ;;  %v623_v63 = vld [vmem:[#allocation5 + $0x20] sm:$0xff] }
 0x465   :  { %v461_v22 = vmul.f32 %v870_v52, %v460_v19  ;;  %v572_v31 = vmul.f32 %v882_v21, %v1230_v3  ;;  %vm469_vm9 = vmor %vm467_vm6, %vm468_vm5  ;;  %v569_v49 = vsel %vm566_vm13, %v568_v48, %v564_v46  ;;  %vm577_vm14 = vweird.f32 %v882_v21  ;;  %v619_v4 = vld [vmem:[#allocation5] sm:$0xff] }
 0x466   :  { %v464_v23 = vsub.f32 1.0, %v463_v18  ;;  %v570_v51 = vmul.f32 %v1212_v41, %v569_v49  ;;  %v580_v52 = vand.u32 2147483647, %v1230_v3  ;;  %vm578_vm0 = vmor %vm576_vm15, %vm577_vm14  ;;  %v625_v41 = vld [vmem:[#allocation5 + $0x30] sm:$0xff]  ;;  %v724_v32 = vld [vmem:[#allocation7 + $0x20] sm:$0xff] }
 0x467   :  { %835 = vmatmul.msk.f32.vlgmr.msrb.gmra.mxu2 %vm319_vm7, %v461_v22  ;;  %v573_v39 = vsub.f32 1.0, %v572_v31  ;;  %648 = vmatpush.msrb.mxu3 %v625_v41  ;;  %v621_v3 = vld [vmem:[#allocation5 + $0x10] sm:$0xff] }
 0x468   :  { %v465_v35 = vmul.f32 %v880_v15, %v464_v23  ;;  %vm581_vm1 = vcmp.eq.f32.partialorder %v580_v52, 8.507059e+37  ;;  %v735_v23 = vld [vmem:[#allocation7 + $0x78] sm:$0xff]  ;;  %v730_v31 = vld [vmem:[#allocation7 + $0x50] sm:$0xff] }
 0x469   :  { %v574_v47 = vmul.f32 %v882_v21, %v573_v39  ;;  %649 = vmatpush.msrb.mxu3 %v624_v62  ;;  %740 = vmatpush.msrb.mxu0 %v735_v23  ;;  %v723_v39 = vld [vmem:[#allocation7 + $0x18] sm:$0xff] }
 0x46a   :  { %v466_v30 = vadd.f32 %v880_v15, %v465_v35  ;;  %v728_v35 = vld [vmem:[#allocation7 + $0x40] sm:$0xff]  ;;  %v780_v52 = vld [vmem:[#allocation8 + $0x78] sm:$0xff] }
 0x46b   :  { %v575_v50 = vadd.f32 %v882_v21, %v574_v47  ;;  %650 = vmatpush.msrb.mxu3 %v623_v63  ;;  %785 = vmatpush.msra.mxu1 %v780_v52  ;;  %v776_v62 = vld [vmem:[#allocation8 + $0x58] sm:$0xff] }
 0x46c   :  { %v470_v38 = vsel %vm469_vm9, %v880_v15, %v466_v30  ;;  %v726_v30 = vld [vmem:[#allocation7 + $0x30] sm:$0xff] }
 0x46d   :  { %v475_v42 = vsel %vm472_vm10, %v474_v37, %v470_v38  ;;  %v579_v53 = vsel %vm578_vm0, %v882_v21, %v575_v50  ;;  %651 = vmatpush.msrb.mxu3 %v622_v2  ;;  %v725_v37 = vld [vmem:[#allocation7 + $0x28] sm:$0xff]  ;;  %v722_v38 = vld [vmem:[#allocation7 + $0x10] sm:$0xff] }
 0x46e   :  { %v476_v44 = vmul.f32 %v1219_v57, %v475_v42  ;;  %v584_v55 = vsel %vm581_vm1, %v583_v54, %v579_v53  ;;  %v720_v42 = vld [vmem:[#allocation7] sm:$0xff]  ;;  %v779_v53 = vld [vmem:[#allocation8 + $0x70] sm:$0xff] }
 0x46f   :  { %v585_v57 = vmul.f32 %v1217_v56, %v584_v55  ;;  %652 = vmatpush.msrb.mxu3 %v621_v3  ;;  %v620_v56 = vld [vmem:[#allocation5 + $0x8] sm:$0xff]  ;;  %786 = vmatpush.msra.mxu1 %v779_v53  ;;  %v775_v2 = vld [vmem:[#allocation8 + $0x50] sm:$0xff] }
 0x470   :  { %836 = vmatmul.msk.f32.gmra.mxu2 %vm319_vm7, %v476_v44 }
 0x471   :  { %653 = vmatpush.msrb.mxu3 %v620_v56  ;;  %787 = vmatpush.msra.mxu1 %v778_v58  ;;  %v774_v56 = vld [vmem:[#allocation8 + $0x48] sm:$0xff] }
 0x473   :  { %654 = vmatpush.msrb.mxu3 %v619_v4  ;;  %788 = vmatpush.msra.mxu1 %v777_v60 }
 0x475   :  { %789 = vmatpush.msra.mxu1 %v776_v62 }
 0x477   :  { %790 = vmatpush.msra.mxu1 %v775_v2 }
 0x478   :  { %837 = vmatmul.msk.f32.vlgmr.msra.gmra.mxu2 %vm319_vm7, %v570_v51 }
 0x479   :  { %791 = vmatpush.msra.mxu1 %v774_v56 }
 0x480   :  { %838 = vmatmul.msk.f32.gmra.mxu2 %vm319_vm7, %v585_v57 }
 0x4ea   :  { %v500_v5 = vpop.f32.mrf.mxu2 }
 0x4eb   :  { %v506_v7 = vmul.f32 %v500_v5, %v1193_v24  ;;  %v773_v5 = vld [vmem:[#allocation8 + $0x40] sm:$0xff] }
 0x4ec   :  { %792 = vmatpush.msra.mxu1 %v773_v5 }
 0x4ed   :  { %v508_v10 = vadd.f32 %v506_v7, %v397_v8  ;;  %v772_v8 = vld [vmem:[#allocation8 + $0x38] sm:$0xff] }
 0x4ee   :  { %793 = vmatpush.msra.mxu1 %v772_v8 }
 0x4f3   :  { %v503_v6 = vpop.f32.mrf.mxu2 }
 0x4f4   :  { %v507_v13 = vmul.f32 %v503_v6, %v1193_v24 }
 0x4f6   :  { %v509_v16 = vadd.f32 %v507_v13, %v398_v14  ;;  %v771_v13 = vld [vmem:[#allocation8 + $0x30] sm:$0xff] }
 0x4f7   :  { %794 = vmatpush.msra.mxu1 %v771_v13 }
 0x4fb   :  { %v609_v9 = vpop.f32.mrf.mxu2 }
 0x4fc   :  { %v615_v11 = vmul.f32 %v609_v9, %v1152_v33 }
 0x4fe   :  { %v617_v12 = vadd.f32 %v615_v11, %v508_v10 }
 0x500   :  { %655 = vmatmul.f32.vlgmr.msrb.gmra.mxu3 %v617_v12  ;;  %v851_v12 = vld [vmem:[%s1306_s8] ss:$0 sm:$0xff] }
 0x503   :  { %v612_v15 = vpop.f32.mrf.mxu2 }
 0x504   :  { %v616_v17 = vmul.f32 %v612_v15, %v1152_v33 }
 0x506   :  { %v618_v18 = vadd.f32 %v616_v17, %v509_v16  ;;  %v852_v17 = vld [vmem:[%s1307_s9] ss:$0 sm:$0xff] }
 0x508   :  { %658 = vmatmul.f32.gmra.mxu3 %v618_v18  ;;  %v770_v18 = vld [vmem:[#allocation8 + $0x28] sm:$0xff] }
 0x509   :  { %795 = vmatpush.msra.mxu1 %v770_v18 }
 0x583   :  { %v656_v19 = vpop.f32.mrf.mxu3 }
 0x584   :  { %v657_v20 = vadd.f32 %v850_v27, %v656_v19 }
 0x586   :  { %v1265_v21 = vadd.f32 %v657_v20, %v1128_v1  ;;  %v734_v1 = vld [vmem:[#allocation7 + $0x70] sm:$0xff]  ;;  %v769_v20 = vld [vmem:[#allocation8 + $0x20] sm:$0xff] }
 0x587   :  { %741 = vmatpush.msrb.mxu0 %v734_v1  ;;  %796 = vmatpush.msra.mxu1 %v769_v20 }
 0x588   :  { %666 = vadd.xlane.f32.xlu1 %v1265_v21  ;;  %v672_v34 = vmul.f32 %v1265_v21, %v1265_v21 }
 0x589   :  { %742 = vmatpush.msrb.mxu0 %v733_v25 }
 0x58a   :  { %674 = vadd.xlane.f32.xlu2 %v672_v34 }
 0x58b   :  { %v659_v24 = vpop.f32.mrf.mxu3  ;;  %743 = vmatpush.msrb.mxu0 %v732_v26 }
 0x58c   :  { %v660_v28 = vadd.f32 %v850_v27, %v659_v24 }
 0x58d   :  { %744 = vmatpush.msrb.mxu0 %v731_v29 }
 0x58e   :  { %v1271_v33 = vadd.f32 %v660_v28, %v1123_v0  ;;  %v729_v0 = vld [vmem:[#allocation7 + $0x48] sm:$0xff]  ;;  %v768_v28 = vld [vmem:[#allocation8 + $0x18] sm:$0xff] }
 0x58f   :  { %745 = vmatpush.msrb.mxu0 %v730_v31  ;;  %797 = vmatpush.msra.mxu1 %v768_v28  ;;  %v767_v31 = vld [vmem:[#allocation8 + $0x10] sm:$0xff] }
 0x590   :  { %668 = vadd.xlane.f32.xlu0 %v1271_v33  ;;  %v673_v22 = vmul.f32 %v1271_v33, %v1271_v33 }
 0x591   :  { %746 = vmatpush.msrb.mxu0 %v729_v0  ;;  %798 = vmatpush.msra.mxu1 %v767_v31  ;;  %v766_v0 = vld [vmem:[#allocation8 + $0x8] sm:$0xff] }
 0x592   :  { %676 = vadd.xlane.f32.xlu1 %v673_v22 }
 0x593   :  { %747 = vmatpush.msrb.mxu0 %v728_v35  ;;  %799 = vmatpush.msra.mxu1 %v766_v0  ;;  %v765_v35 = vld [vmem:[#allocation8] sm:$0xff] }
 0x595   :  { %748 = vmatpush.msrb.mxu0 %v727_v36  ;;  %800 = vmatpush.msra.mxu1 %v765_v35  ;;  %v853_v36 = vld [vmem:[%s1309_s11] ss:$0 sm:$0xff]  ;;  %s816_s11 = sshll.u32 %s1023_s15, 4  ;;  %s817_s11 = int_to_ptr.vmem [resolvable:$true] %s816_s11 }
 0x597   :  { %749 = vmatpush.msrb.mxu0 %v726_v30 }
 0x599   :  { %750 = vmatpush.msrb.mxu0 %v725_v37 }
 0x59b   :  { %751 = vmatpush.msrb.mxu0 %v724_v32 }
 0x59d   :  { %752 = vmatpush.msrb.mxu0 %v723_v39 }
 0x59f   :  { %753 = vmatpush.msrb.mxu0 %v722_v38 }
 0x5a1   :  { %754 = vmatpush.msrb.mxu0 %v721_v40 }
 0x5a3   :  { %755 = vmatpush.msrb.mxu0 %v720_v42  ;;  %v854_v42 = vld [vmem:[%s1311_s13] ss:$0 sm:$0xff] }
 0x5fb   :  { %v667_v43 = vpop.xlane.xlu1 %666 }
 0x5fc   :  { %v670_v44 = vmul.f32 0.033333335, %v667_v43 }
 0x5fd   :  { %v675_v46 = vpop.xlane.xlu2 %674 }
 0x5fe   :  { %v680_v47 = vmul.f32 %v670_v44, %v670_v44  ;;  %v678_v48 = vmul.f32 0.033333335, %v675_v46  ;;  %v684_v11 = vsub.f32 %v1265_v21, %v670_v44 }
 0x600   :  { %v682_v49 = vsub.f32 %v678_v48, %v680_v47 }
 0x602   :  { %v686_v50 = vadd.f32 1e-05, %v682_v49 }
 0x603   :  { %v669_v45 = vpop.xlane.xlu0 %668 }
 0x604   :  { %883 = vrsqrt.f32 %v686_v50  ;;  %v671_v51 = vmul.f32 0.033333335, %v669_v45  ;;  %vm694_vm2 = vweird.f32 %v686_v50 }
 0x605   :  { %v677_v54 = vpop.xlane.xlu1 %676 }
 0x606   :  { %v681_v55 = vmul.f32 %v671_v51, %v671_v51  ;;  %v679_v57 = vmul.f32 0.033333335, %v677_v54  ;;  %v685_v23 = vsub.f32 %v1271_v33, %v671_v51 }
 0x608   :  { %v683_v59 = vsub.f32 %v679_v57, %v681_v55 }
 0x60a   :  { %v884_v61 = vpop.eup %883  ;;  %v687_v41 = vadd.f32 1e-05, %v683_v59 }
 0x60b   :  { %v689_v63 = vmul.f32 %v884_v61, %v686_v50  ;;  %vm695_vm7 = vweird.f32 %v884_v61 }
 0x60c   :  { %885 = vrsqrt.f32 %v687_v41  ;;  %vm696_vm3 = vmor %vm694_vm2, %vm695_vm7  ;;  %vm704_vm5 = vweird.f32 %v687_v41 }
 0x60d   :  { %v690_v3 = vmul.f32 %v884_v61, %v689_v63 }
 0x60f   :  { %v691_v4 = vmul.f32 0.5, %v690_v3 }
 0x611   :  { %v692_v6 = vsub.f32 1.5, %v691_v4 }
 0x612   :  { %v886_v7 = vpop.eup %885 }
 0x613   :  { %v693_v9 = vmul.f32 %v884_v61, %v692_v6  ;;  %v699_v10 = vmul.f32 %v886_v7, %v687_v41  ;;  %vm705_vm4 = vweird.f32 %v886_v7 }
 0x614   :  { %vm706_vm6 = vmor %vm704_vm5, %vm705_vm4 }
 0x615   :  { %v700_v14 = vmul.f32 %v886_v7, %v699_v10  ;;  %v697_v15 = vsel %vm696_vm3, %v884_v61, %v693_v9 }
 0x616   :  { %v708_v16 = vmul.f32 %v697_v15, %v684_v11 }
 0x617   :  { %v701_v27 = vmul.f32 0.5, %v700_v14 }
 0x618   :  { %v713_v19 = vmul.f32 %v851_v12, %v708_v16 }
 0x619   :  { %v702_v34 = vsub.f32 1.5, %v701_v27 }
 0x61a   :  { %v718_v24 = vadd.f32 %v852_v17, %v713_v19 }
 0x61b   :  { %v703_v22 = vmul.f32 %v886_v7, %v702_v34 }
 0x61c   :  { %756 = vmatmul.f32.vlgmr.msrb.gmra.mxu0 %v718_v24 }
 0x61d   :  { %v707_v1 = vsel %vm706_vm6, %v886_v7, %v703_v22 }
 0x61e   :  { %v709_v25 = vmul.f32 %v707_v1, %v685_v23 }
 0x620   :  { %v714_v26 = vmul.f32 %v851_v12, %v709_v25 }
 0x622   :  { %v719_v29 = vadd.f32 %v852_v17, %v714_v26 }
 0x624   :  { %759 = vmatmul.f32.gmra.mxu0 %v719_v29 }
 0x699   :  { %v757_v30 = vpop.f32.mrf.mxu0 }
 0x69a   :  { %v758_v37 = vadd.f32 %v853_v36, %v757_v30 }
 0x69c   :  { %v763_v32 = vmax.f32 %v758_v37, 0.0 }
 0x69e   :  { %801 = vmatmul.f32.vlgmr.msra.gmra.mxu1 %v763_v32 }
 0x6a1   :  { %v760_v39 = vpop.f32.mrf.mxu0 }
 0x6a2   :  { %v761_v38 = vadd.f32 %v853_v36, %v760_v39 }
 0x6a4   :  { %v764_v40 = vmax.f32 %v761_v38, 0.0 }
 0x6a6   :  { %804 = vmatmul.f32.gmra.mxu1 %v764_v40 }
 0x71b   :  { %v802_v43 = vpop.f32.mrf.mxu1 }
 0x71c   :  { %v803_v44 = vadd.f32 %v854_v42, %v802_v43 }
 0x71e   :  { %v808_v46 = vadd.f32 %v803_v44, %v1265_v21 }
 0x720   :  { %810 = vst [vmem:[#allocation10] sm:$0xff] %v808_v46 }
 0x723   :  { %v805_v47 = vpop.f32.mrf.mxu1 }
 0x724   :  { %v806_v48 = vadd.f32 %v854_v42, %v805_v47 }
 0x726   :  { %v809_v49 = vadd.f32 %v806_v48, %v1271_v33 }
 0x728   :  { %811 = vst [vmem:[#allocation10 + $0x8] sm:$0xff] %v809_v49 }
 0x729   :  { %824 = dma.vmem_to_hbm [thread:$0]  %s817_s11, 256, %s819_s12, [#allocation4], %s1016_s21, %s1016_s21, %s1017_s22  }
 0x72a   :  { %1013 = dma.done.wait [#allocation4], 256  }
 0x72b   :  { %1014 = vsyncadd [#allocation4], 4294967040 }
 0x72c   :  { %829 = vsyncpa [#allocation3], 1 }
 0x72d   :  { %830 = vsyncpa [#allocation6], 1 }
 0x72e   :  { %831 = vsyncpa [#allocation9], 1 }
 0x72f   :  { %832 = vsyncpa [#allocation4], 1 }

</bundles_post_ra>
